<compile_context>
chip_gen: v7x
topology: tpu7x:2x2x1
jax: 0.10.0
libtpu: 0.0.40
codegen_flags: <defaults>
</compile_context>

<pallas_src>
import functools

import jax
import jax.numpy as jnp
from jax.experimental import pallas as pl
from jax.experimental.pallas import tpu as pltpu

NUM_LAYERS = 10
HIDDEN = 10          # inner hidden size of BasicBlock (Linear(features, 10))
LANE = 128           # TPU lane width
SUBLANE = 8          # f32 sublane multiple


def _round_up(n, m):
    return ((n + m - 1) // m) * m


def mymodel_kernel(x_ref, w_ref, out_ref, x_scratch):
    """One grid step == one residual block (last step == final projection).

    x_ref    : (Bp, PAD)      f32  resident input; col F is the constant 1 (bias fold)
    w_ref    : (2, PAD, PAD)  bf16 streamed weight pair for this step
    out_ref  : (Bp, PAD)      f32  resident lane-dense output (written at last step)
    x_scratch: (Bp, PAD)      f32  persistent residual stream across grid steps
    """
    step = pl.program_id(0)
    last = pl.num_programs(0) - 1

    @pl.when(step == 0)
    def _():
        x_scratch[...] = x_ref[...]

    @pl.when(step < last)
    def _():
        x = x_scratch[...]
        h = jnp.dot(x.astype(jnp.bfloat16), w_ref[0],
                    preferred_element_type=jnp.float32)
        h = jnp.maximum(h, 0.0)                               # ReLU (aug col H stays 1)
        y = jnp.dot(h.astype(jnp.bfloat16), w_ref[1],
                    preferred_element_type=jnp.float32)
        x_scratch[...] = jnp.maximum(y + x, 0.0)              # residual + ReLU

    @pl.when(step == last)
    def _():
        out_ref[...] = jnp.dot(x_scratch[...].astype(jnp.bfloat16), w_ref[0],
                               preferred_element_type=jnp.float32)


@functools.partial(jax.jit, static_argnums=(2, 3))
def mymodel_forward(x, w_packed, features, predictions):
    B = x.shape[0]
    pad = w_packed.shape[-1]
    Bp = max(SUBLANE, _round_up(B, SUBLANE))      # sublane-aligned batch

    # Augment x with the constant-1 column (bias fold), zero-pad lanes + batch rows.
    x_pad = jnp.zeros((Bp, pad), jnp.float32)
    x_pad = x_pad.at[:B, :features].set(x.astype(jnp.float32))
    x_pad = x_pad.at[:, features].set(1.0)

    n_steps = w_packed.shape[0] // 2              # NUM_LAYERS + 1
    # Useful (unpadded) FLOPs — advisory only.
    cost = pl.CostEstimate(
        flops=2 * B * (2 * NUM_LAYERS * features * HIDDEN + features * predictions),
        transcendentals=0,
        bytes_accessed=x_pad.size * 4 + w_packed.size * 2 + Bp * pad * 4,
    )

    out = pl.pallas_call(
        mymodel_kernel,
        out_shape=jax.ShapeDtypeStruct((Bp, pad), jnp.float32),
        grid_spec=pltpu.PrefetchScalarGridSpec(
            num_scalar_prefetch=0,
            grid=(n_steps,),
            in_specs=[
                pl.BlockSpec((Bp, pad), lambda s: (0, 0)),        # resident input
                pl.BlockSpec((2, pad, pad), lambda s: (s, 0, 0)),  # streamed weights
            ],
            out_specs=pl.BlockSpec((Bp, pad), lambda s: (0, 0)),   # resident output
            scratch_shapes=[pltpu.VMEM((Bp, pad), jnp.float32)],   # residual stream
        ),
        compiler_params=pltpu.CompilerParams(
            dimension_semantics=("arbitrary",)),
        cost_estimate=cost,
    )(x_pad, w_packed)
    return out[:B, :predictions]


def init_params(key, features, predictions, num_layers=NUM_LAYERS):
    """PyTorch-equivalent raw parameters."""
    keys = jax.random.split(key, 4 * num_layers + 2)
    w1 = jnp.stack([jax.random.normal(keys[4 * l + 0], (features, HIDDEN), jnp.float32) * 0.1
                    for l in range(num_layers)])
    b1 = jnp.stack([jax.random.normal(keys[4 * l + 1], (1, HIDDEN), jnp.float32) * 0.1
                    for l in range(num_layers)])
    w2 = jnp.stack([jax.random.normal(keys[4 * l + 2], (HIDDEN, features), jnp.float32) * 0.1
                    for l in range(num_layers)])
    b2 = jnp.stack([jax.random.normal(keys[4 * l + 3], (1, features), jnp.float32) * 0.1
                    for l in range(num_layers)])
    wf = jax.random.normal(keys[-2], (features, predictions), jnp.float32) * 0.1
    bf = jax.random.normal(keys[-1], (1, predictions), jnp.float32) * 0.1
    return w1, b1, w2, b2, wf, bf


def pack_params(w1, b1, w2, b2, wf, bf, features, predictions):
    """Fold biases into lane-padded augmented weights; one bf16 slab of layer pairs.

    Slab layout (2*(L+1), PAD, PAD): [2l]=W1_aug(l), [2l+1]=W2_aug(l),
    [2L]=Wf_aug, [2L+1]=zeros (padding so every grid step streams a pair).
    """
    L = w1.shape[0]
    F, H, P = features, HIDDEN, predictions
    pad = _round_up(max(F + 1, H + 1, P), LANE)
    W = jnp.zeros((2 * (L + 1), pad, pad), jnp.float32)
    for l in range(L):
        # W1_aug: x_aug -> h_aug, h_aug[:, H] == 1 (passthrough of x col F == 1)
        W = W.at[2 * l, :F, :H].set(w1[l])
        W = W.at[2 * l, F, :H].set(b1[l, 0])
        W = W.at[2 * l, F, H].set(1.0)
        # W2_aug: h_aug -> y_aug; y_aug col F == 0 so residual keeps x col F == 1
        W = W.at[2 * l + 1, :H, :F].set(w2[l])
        W = W.at[2 * l + 1, H, :F].set(b2[l, 0])
    # Final projection with folded bias.
    W = W.at[2 * L, :F, :P].set(wf)
    W = W.at[2 * L, F, :P].set(bf[0])

    # --- bias-fold invariants (ReLU must preserve the augmented 1) ---
    col_h = W[0:2 * L:2, :, H]                 # W1_aug column H, every layer
    assert bool(jnp.all(col_h[:, F] == 1.0)), "W1_aug[F, H] must be 1"
    assert bool(jnp.all(jnp.sum(col_h, axis=1) == 1.0)), \
        "W1_aug column H must be one-hot at row F"
    col_f = W[1:2 * L + 1:2, :, F]             # W2_aug column F, every layer
    assert bool(jnp.all(col_f == 0.0)), "W2_aug column F must be all-zero"

    return W.astype(jnp.bfloat16)


def reference_forward_f32(x, w1, b1, w2, b2, wf, bf):
    """Pure-JAX f32 reference of the PyTorch module semantics."""
    out = x
    for l in range(NUM_LAYERS):
        h = jnp.maximum(out @ w1[l] + b1[l], 0.0)
        out = jnp.maximum(h @ w2[l] + b2[l] + out, 0.0)
    return out @ wf + bf


def reference_forward_matched(x, w_packed, features, predictions):
    """Pure-JAX reference with the exact kernel precision (bf16 feed, f32 accum)."""
    B = x.shape[0]
    pad = w_packed.shape[-1]
    xp = jnp.zeros((B, pad), jnp.float32)
    xp = xp.at[:, :features].set(x.astype(jnp.float32))
    xp = xp.at[:, features].set(1.0)
    for l in range(NUM_LAYERS):
        h = jnp.maximum(jnp.dot(xp.astype(jnp.bfloat16), w_packed[2 * l],
                                preferred_element_type=jnp.float32), 0.0)
        y = jnp.dot(h.astype(jnp.bfloat16), w_packed[2 * l + 1],
                    preferred_element_type=jnp.float32)
        xp = jnp.maximum(y + xp, 0.0)
    out = jnp.dot(xp.astype(jnp.bfloat16), w_packed[2 * NUM_LAYERS],
                  preferred_element_type=jnp.float32)
    return out[:, :predictions]


if __name__ == "__main__":
    batch, features, predictions = 8, 32, 8
    key = jax.random.PRNGKey(0)
    kx, kp = jax.random.split(key)
    x = jax.random.normal(kx, (batch, features), jnp.float32)
    raw = init_params(kp, features, predictions)
    w_packed = pack_params(*raw, features=features, predictions=predictions)

    out = jax.block_until_ready(mymodel_forward(x, w_packed, features, predictions))
    assert out.shape == (batch, predictions)

    # Exact-precision check (same bf16/f32 mixed-precision math as the kernel).
    ref_matched = reference_forward_matched(x, w_packed, features, predictions)
    assert jnp.allclose(out, ref_matched, atol=1e-3, rtol=1e-3), "precision-matched mismatch"

    # Semantic check against the pure-f32 PyTorch-equivalent forward
    # (loose tolerance due to intentional bf16 MXU feed).
    ref_f32 = reference_forward_f32(x, *raw)
    assert jnp.allclose(out, ref_f32, atol=1e-1, rtol=1e-1), "f32 semantic mismatch"

    # Arbitrary (non-multiple-of-8) batch exercises the wrapper's row padding.
    x_odd = jax.random.normal(jax.random.PRNGKey(1), (5, features), jnp.float32)
    out_odd = jax.block_until_ready(mymodel_forward(x_odd, w_packed, features, predictions))
    ref_odd = reference_forward_f32(x_odd, *raw)
    assert out_odd.shape == (5, predictions)
    assert jnp.allclose(out_odd, ref_odd, atol=1e-1, rtol=1e-1), "padded-batch mismatch"

    print("KERNEL_OK")
</pallas_src>

<mosaic_0001>
module attributes {stable_mosaic.version = 11 : i64} {
  func.func @mymodel_kernel(%arg0: i32, %arg1: memref<8x128xf32, #tpu.memory_space<vmem>>, %arg2: memref<2x128x128xbf16, #tpu.memory_space<vmem>>, %arg3: memref<8x128xf32, #tpu.memory_space<vmem>>, %arg4: memref<8x128xf32, #tpu.memory_space<vmem>>) attributes {dimension_semantics = [#tpu.dimension_semantics<arbitrary>], iteration_bounds = array<i64: 11>, scalar_prefetch = 0 : i64, scratch_operands = 1 : i64, tpu.core_type = #tpu.core_type<tc>, window_params = [{pipeline_mode = #tpu.pipeline_mode<synchronous>, transform_indices = @transform_0, window_bounds = array<i64: 8, 128>}, {transform_indices = @transform_1, window_bounds = array<i64: 2, 128, 128>}, {pipeline_mode = #tpu.pipeline_mode<synchronous>, transform_indices = @transform_2, window_bounds = array<i64: 8, 128>}]} {
    %c0_i32 = arith.constant 0 : i32
    %0 = arith.cmpi eq, %arg0, %c0_i32 : i32
    %1 = arith.extui %0 : i1 to i32
    %c0_i32_0 = arith.constant 0 : i32
    %2 = arith.cmpi ne, %1, %c0_i32_0 : i32
    scf.if %2 {
      %c0 = arith.constant 0 : index
      %c0_4 = arith.constant 0 : index
      %9 = vector.load %arg1[%c0, %c0_4] : memref<8x128xf32, #tpu.memory_space<vmem>>, vector<8x128xf32>
      %c0_5 = arith.constant 0 : index
      %c0_6 = arith.constant 0 : index
      %10 = vector.load %arg4[%c0_5, %c0_6] : memref<8x128xf32, #tpu.memory_space<vmem>>, vector<8x128xf32>
      tpu.vector_store %arg4[%c0_5, %c0_6], %9 {strides = array<i32>} : memref<8x128xf32, #tpu.memory_space<vmem>>, vector<8x128xf32>,
    } else {
    }
    %c10_i32 = arith.constant 10 : i32
    %3 = arith.cmpi slt, %arg0, %c10_i32 : i32
    %4 = arith.extui %3 : i1 to i32
    %c0_i32_1 = arith.constant 0 : i32
    %5 = arith.cmpi ne, %4, %c0_i32_1 : i32
    scf.if %5 {
      %c0 = arith.constant 0 : index
      %c0_4 = arith.constant 0 : index
      %9 = vector.load %arg4[%c0, %c0_4] : memref<8x128xf32, #tpu.memory_space<vmem>>, vector<8x128xf32>
      %10 = arith.truncf %9 : vector<8x128xf32> to vector<8x128xbf16>
      %c0_5 = arith.constant 0 : index
      %c0_6 = arith.constant 0 : index
      %c0_7 = arith.constant 0 : index
      %11 = vector.load %arg2[%c0_5, %c0_6, %c0_7] : memref<2x128x128xbf16, #tpu.memory_space<vmem>>, vector<1x128x128xbf16>
      %12 = vector.shape_cast %11 : vector<1x128x128xbf16> to vector<128x128xbf16>
      %cst = arith.constant dense<0.000000e+00> : vector<8x128xf32>
      %13 = tpu.matmul %10, %12, %cst {dimension_numbers = #tpu.dot_dimension_numbers<[1], [0], [0], [1], [0, 0, 1, 1], [], []>} : vector<8x128xbf16>, vector<128x128xbf16>, vector<8x128xf32> -> vector<8x128xf32>
      %cst_8 = arith.constant 0.000000e+00 : f32
      %14 = vector.broadcast %cst_8 : f32 to vector<8x128xf32>
      %15 = arith.maximumf %13, %14 : vector<8x128xf32>
      %16 = arith.truncf %15 : vector<8x128xf32> to vector<8x128xbf16>
      %c1 = arith.constant 1 : index
      %c0_9 = arith.constant 0 : index
      %c0_10 = arith.constant 0 : index
      %17 = vector.load %arg2[%c1, %c0_9, %c0_10] : memref<2x128x128xbf16, #tpu.memory_space<vmem>>, vector<1x128x128xbf16>
      %18 = vector.shape_cast %17 : vector<1x128x128xbf16> to vector<128x128xbf16>
      %cst_11 = arith.constant dense<0.000000e+00> : vector<8x128xf32>
      %19 = tpu.matmul %16, %18, %cst_11 {dimension_numbers = #tpu.dot_dimension_numbers<[1], [0], [0], [1], [0, 0, 1, 1], [], []>} : vector<8x128xbf16>, vector<128x128xbf16>, vector<8x128xf32> -> vector<8x128xf32>
      %20 = arith.addf %19, %9 : vector<8x128xf32>
      %cst_12 = arith.constant 0.000000e+00 : f32
      %21 = vector.broadcast %cst_12 : f32 to vector<8x128xf32>
      %22 = arith.maximumf %20, %21 : vector<8x128xf32>
      %c0_13 = arith.constant 0 : index
      %c0_14 = arith.constant 0 : index
      %23 = vector.load %arg4[%c0_13, %c0_14] : memref<8x128xf32, #tpu.memory_space<vmem>>, vector<8x128xf32>
      tpu.vector_store %arg4[%c0_13, %c0_14], %22 {strides = array<i32>} : memref<8x128xf32, #tpu.memory_space<vmem>>, vector<8x128xf32>,
    } else {
    }
    %c10_i32_2 = arith.constant 10 : i32
    %6 = arith.cmpi eq, %arg0, %c10_i32_2 : i32
    %7 = arith.extui %6 : i1 to i32
    %c0_i32_3 = arith.constant 0 : i32
    %8 = arith.cmpi ne, %7, %c0_i32_3 : i32
    scf.if %8 {
      %c0 = arith.constant 0 : index
      %c0_4 = arith.constant 0 : index
      %9 = vector.load %arg4[%c0, %c0_4] : memref<8x128xf32, #tpu.memory_space<vmem>>, vector<8x128xf32>
      %10 = arith.truncf %9 : vector<8x128xf32> to vector<8x128xbf16>
      %c0_5 = arith.constant 0 : index
      %c0_6 = arith.constant 0 : index
      %c0_7 = arith.constant 0 : index
      %11 = vector.load %arg2[%c0_5, %c0_6, %c0_7] : memref<2x128x128xbf16, #tpu.memory_space<vmem>>, vector<1x128x128xbf16>
      %12 = vector.shape_cast %11 : vector<1x128x128xbf16> to vector<128x128xbf16>
      %cst = arith.constant dense<0.000000e+00> : vector<8x128xf32>
      %13 = tpu.matmul %10, %12, %cst {dimension_numbers = #tpu.dot_dimension_numbers<[1], [0], [0], [1], [0, 0, 1, 1], [], []>} : vector<8x128xbf16>, vector<128x128xbf16>, vector<8x128xf32> -> vector<8x128xf32>
      %c0_8 = arith.constant 0 : index
      %c0_9 = arith.constant 0 : index
      %14 = vector.load %arg3[%c0_8, %c0_9] : memref<8x128xf32, #tpu.memory_space<vmem>>, vector<8x128xf32>
      tpu.vector_store %arg3[%c0_8, %c0_9], %13 {strides = array<i32>} : memref<8x128xf32, #tpu.memory_space<vmem>>, vector<8x128xf32>,
    } else {
    }
    return
  }
  func.func @transform_0(%arg0: i32) -> (i32, i32) {
    %c0_i32 = arith.constant 0 : i32
    %c0_i32_0 = arith.constant 0 : i32
    %c0_i32_1 = arith.constant 0 : i32
    return %c0_i32, %c0_i32_0 : i32, i32
  }
  func.func @transform_1(%arg0: i32) -> (i32, i32, i32) {
    %c0_i32 = arith.constant 0 : i32
    %c0_i32_0 = arith.constant 0 : i32
    %c0_i32_1 = arith.constant 0 : i32
    return %arg0, %c0_i32, %c0_i32_0 : i32, i32, i32
  }
  func.func @transform_2(%arg0: i32) -> (i32, i32) {
    %c0_i32 = arith.constant 0 : i32
    %c0_i32_0 = arith.constant 0 : i32
    %c0_i32_1 = arith.constant 0 : i32
    return %c0_i32, %c0_i32_0 : i32, i32
  }
}

</mosaic_0001>

<bundles_post_ra>
// kernel: mymodel_forward.1
= control target key start
LH: loop header
LB: loop body
LE: loop exit
PB: predicated region body
PF: predicated region fallthrough
CT: control target
= control target key end

     0   :  { %7 = vsyncpa [#allocation4], 0  ;;  %s1044_s0 = inlined_call_operand.vmem [shape: f32[8,128], index: 0, kind: input, shape index: {}]   ;;  %s1045_s1 = inlined_call_operand.hbm [shape: bf16[22,128,128], index: 1, kind: input, shape index: {}]   ;;  %s1046_s2 = inlined_call_operand.hbm [shape: f32[8,128], index: 2, kind: output, shape index: {}]  }
   0x1   :  { %9 = vsyncpa [#allocation4 + $0x1], 0 }
   0x2   :  { %10 = vsyncpa [#allocation5], 0  ;;  %s886_s9 = smov 0   ;;  %s888_s10 = smov 0  }
   0x3   :  { %s890_s11 = smov 0   ;;  %s892_s12 = smov 0  }
   0x4 LB: > { %s905_s13 = sadd.s32 4294967295, %s861_s12   ;;  %s908_s14 = sadd.s32 1, %s861_s12   ;;  %s861_s12 = sphi %s892_s12, %s1053_s12   ;;  %s857_s11 = sphi %s890_s11, %s1052_s11   ;;  %s853_s10 = sphi %s888_s10, %s1051_s10   ;;  %s849_s9 = sphi %s886_s9, %s1050_s9  }
   0x5   : > { %s41_s15 = ssub.s32 %s861_s12, %s908_s14  ;;  %s44_s16 = sadd.s32 1, %s857_s11 }
   0x6   : > { %p42_p0 = scmp.eq.s32.totalorder %s41_s15, 0  ;;  %p51_p1 = scmp.ne.s32.totalorder %s857_s11, %s853_s10 }
   0x7   : > { %p52_p2 = scmp.eq.s32.totalorder %s861_s12, 0  ;;  %p57_p3 = scmp.ne.s32.totalorder %s853_s10, %s849_s9 }
   0x8   : > { %s918_s17 = scalar_select %p42_p0, %s857_s11, %s44_s16  }
   0x9   : > { %p53_p4 = por %p52_p2, %p51_p1  ;;  %p58_p5 = scmp.eq.s32.totalorder %s905_s13, 0 }
   0xa   : > { %p701_p6 = scmp.lt.s32.totalorder %s861_s12, 11  ;;  %s105_s19 = sand.u32 1, %s857_s11  }
   0xb   : > { %p922_p7 = por %p58_p5, %p57_p3  ;;  %s549_s20 = sshll.u32 %s105_s19, 7 }
   0xc   : > { %s603_s21 = sshll.u32 %s861_s12, 11  ;;  %s109_s25 = scalar_lea.vmem [#allocation3], %s549_s20 }
   0xd   : > { %s931_s24 = scalar_lea.hbm %s1045_s1, %s603_s21  ;;  %s117_s26 = sshll.u32 %s109_s25, 4  ;;  %s933_s26 = int_to_ptr.vmem [resolvable:$true] %s117_s26 }
   0xe   : > { %p935_p8 = pnand %p701_p6, %p53_p4  ;;  %s940_s28 = scalar_lea.sflag [#allocation4], %s105_s19 }
   0xf   : > { %s767_s29 = scalar_lea.hbm %s931_s24, 2048  ;;  %s772_s4 = scalar_lea.hbm %s1045_s1, 22528 }
  0x10   : > { %p768_p10 = scmp.ne.s32.totalorder %s931_s24, %s767_s29  ;;  %p769_p11 = pneg %p935_p8 }
  0x11   : > { %p773_p0 = scmp.lt.u32.totalorder %s931_s24, %s1045_s1  ;;  %p774_p1 = scmp.lt.u32.totalorder %s772_s4, %s767_s29 }
  0x12   : > { %p770_p12 = pnand %p769_p11, %p768_p10  ;;  %p776_p3 = scmp.lt.u32.totalorder %s767_s29, %s931_s24 }
  0x13   : > { %p775_p2 = por %p774_p1, %p773_p0 }
  0x14   : > { %p771_p13 = pneg %p770_p12 }
  0x15   : > { %p777_p4 = por %p776_p3, %p775_p2 }
  0x17   : > { %p778_p5 = pnand %p777_p4, %p771_p13 }
  0x19   : > { %781 = shalt.err (!%p778_p5)
}
  0x1a   : > { %s782_s7 = scalar_lea.vmem %s933_s26, 2048  ;;  %s863_s8 = smov [#allocation3]  }
  0x1b   : > { %p783_p6 = scmp.ne.s32.totalorder %s933_s26, %s782_s7  ;;  %s787_s9 = sshll.u32 %s863_s8, 4  ;;  %s788_s9 = int_to_ptr.vmem [resolvable:$false] %s787_s9 }
  0x1c   : > { %s789_s15 = scalar_lea.vmem %s788_s9, 4096  ;;  %p790_p9 = scmp.lt.s32.totalorder %s933_s26, %s788_s9 }
  0x1d   : > { %p785_p10 = pnand %p783_p6, %p769_p11  ;;  %p791_p0 = scmp.lt.s32.totalorder %s789_s15, %s782_s7 }
  0x1f   : > { %p786_p12 = pneg %p785_p10  ;;  %p792_p1 = por %p791_p0, %p790_p9 }
  0x21   : > { %p793_p2 = pnand %p792_p1, %p786_p12 }
  0x23   : > { %796 = shalt.err (!%p793_p2)
}
  0x24   : > { %s864_s16 = smov 64   ;;  %s865_s19 = smov 4  }
  0x25   : > { %700 = dma.hbm_to_vmem [thread:$0]  (!%p935_p8), %s931_s24, 2048, %s933_s26, %s940_s28, %s864_s16, %s864_s16, %s865_s19  }
  0x26   : > { %p125_p11 = scmp.lt.s32.totalorder %s861_s12, 12  ;;  %p1049_p13 = scmp.ge.s32.totalorder %s861_s12, 1 }
  0x28   : > { %p126_p3 = pnand %p1049_p13, %p125_p11 }
  0x29   : > { %s131_s20 = sand.u32 (!%p126_p3), 1, %s853_s10  }
  0x2a   : > { %129 = sbr.rel (%p126_p3) target bundleno = 800 (0x320), region = 28  ;;  %s554_s21 = sshll.u32 (!%p126_p3), %s131_s20, 7 }
  0x2b   : > { %s132_s22 = scalar_lea.sflag (!%p126_p3), [#allocation4], %s131_s20  ;;  %s972_s23 = scalar_lea.vmem (!%p126_p3), [#allocation3], %s554_s21 }
  0x31   : > { %840 = dma.done.wait (%p922_p7), %s132_s22, 2048  }
  0x32   : > { %842 = vsyncadd (%p922_p7), %s132_s22, 4294965248  ;;  %p555_p9 = scmp.ne.s32.totalorder %s905_s13, 0 }
  0x33   : > { %v157_v0 = vld [vmem:[%s1044_s0] sm:$0xff] (!%p555_p9) }
  0x34   : > { %156 = sbr.rel (%p555_p9) target bundleno = 59 (0x3b), region = 36  ;;  %158 = vst [vmem:[#allocation2] sm:$0xff] (!%p555_p9), %v157_v0 }
  0x3b PF: > { %p556_p8 = scmp.ge.s32.totalorder %s905_s13, 10 }
  0x3c   : > { %v743_v1 = vld [vmem:[%s972_s23] sm:$0xff] (!%p556_p8)   ;;  %v866_v2 = vmov (!%p556_p8), 0.0   ;;  %v744_v3 = vld [vmem:[%s972_s23 + $0x8] sm:$0xff] (!%p556_p8)   ;;  %vm867_vm0 = vmmov (!%p556_p8), 0   ;;  %v745_v4 = vld [vmem:[%s972_s23 + $0x10] sm:$0xff] (!%p556_p8)  }
  0x3d   : > { %162 = sbr.rel (%p556_p8) target bundleno = 526 (0x20e), region = 40  ;;  %631 = vmatprep.subr.bf16.mxu0 (!%p556_p8), %v866_v2  ;;  %651 = vmatprep.subr.bf16.mxu1 (!%p556_p8), %v866_v2  ;;  %v751_v5 = vld [vmem:[%s972_s23 + $0x40] sm:$0xff] (!%p556_p8)   ;;  %v746_v6 = vld [vmem:[%s972_s23 + $0x18] sm:$0xff] (!%p556_p8)   ;;  %v752_v7 = vld [vmem:[%s972_s23 + $0x48] sm:$0xff] (!%p556_p8)  }
  0x3e   : > { %632 = vmatpush3.bf16.msra.mxu0 (!%p556_p8), %v743_v1  ;;  %647 = vmatprep.mubr.msk.bf16.mxu0 (!%p556_p8), %vm867_vm0, %v866_v2  ;;  %v747_v8 = vld [vmem:[%s972_s23 + $0x20] sm:$0xff] (!%p556_p8)   ;;  %v753_v9 = vld [vmem:[%s972_s23 + $0x50] sm:$0xff] (!%p556_p8)   ;;  %v748_v10 = vld [vmem:[%s972_s23 + $0x28] sm:$0xff] (!%p556_p8)  }
  0x3f   : > { %633 = vmatprep.subr.bf16.mxu0 (!%p556_p8), %v866_v2  ;;  %667 = vmatprep.mubr.msk.bf16.mxu1 (!%p556_p8), %vm867_vm0, %v866_v2  ;;  %v754_v11 = vld [vmem:[%s972_s23 + $0x58] sm:$0xff] (!%p556_p8)   ;;  %v749_v12 = vld [vmem:[%s972_s23 + $0x30] sm:$0xff] (!%p556_p8)   ;;  %v755_v13 = vld [vmem:[%s972_s23 + $0x60] sm:$0xff] (!%p556_p8)  }
  0x40   : > { %652 = vmatpush3.bf16.msra.mxu1 (!%p556_p8), %v751_v5  ;;  %v750_v14 = vld [vmem:[%s972_s23 + $0x38] sm:$0xff] (!%p556_p8)   ;;  %v756_v16 = vld [vmem:[%s972_s23 + $0x68] sm:$0xff] (!%p556_p8)   ;;  %v757_v18 = vld [vmem:[%s972_s23 + $0x70] sm:$0xff] (!%p556_p8)  }
  0x41   : > { %653 = vmatprep.subr.bf16.mxu1 (!%p556_p8), %v866_v2  ;;  %v163_v15 = vld [vmem:[#allocation2] sm:$0xff] (!%p556_p8) }
  0x42   : > { %634 = vmatpush3.bf16.msra.mxu0 (!%p556_p8), %v744_v3  ;;  %v164_v17 = vpack.c.bf16 (!%p556_p8), %v163_v15, %v163_v15  ;;  %v758_v19 = vld [vmem:[%s972_s23 + $0x78] sm:$0xff] (!%p556_p8)  }
  0x43   : > { %635 = vmatprep.subr.bf16.mxu0 (!%p556_p8), %v866_v2 }
  0x44   : > { %654 = vmatpush3.bf16.msra.mxu1 %v752_v7 }
  0x45   : > { %655 = vmatprep.subr.bf16.mxu1 %v866_v2 }
  0x46   : > { %636 = vmatpush3.bf16.msra.mxu0 %v745_v4 }
  0x47   : > { %637 = vmatprep.subr.bf16.mxu0 %v866_v2 }
  0x48   : > { %656 = vmatpush3.bf16.msra.mxu1 %v753_v9 }
  0x49   : > { %657 = vmatprep.subr.bf16.mxu1 %v866_v2 }
  0x4a   : > { %638 = vmatpush3.bf16.msra.mxu0 %v746_v6 }
  0x4b   : > { %639 = vmatprep.subr.bf16.mxu0 %v866_v2 }
  0x4c   : > { %658 = vmatpush3.bf16.msra.mxu1 %v754_v11 }
  0x4d   : > { %659 = vmatprep.subr.bf16.mxu1 %v866_v2 }
  0x4e   : > { %640 = vmatpush3.bf16.msra.mxu0 %v747_v8 }
  0x4f   : > { %641 = vmatprep.subr.bf16.mxu0 %v866_v2 }
  0x50   : > { %660 = vmatpush3.bf16.msra.mxu1 %v755_v13 }
  0x51   : > { %661 = vmatprep.subr.bf16.mxu1 %v866_v2 }
  0x52   : > { %642 = vmatpush3.bf16.msra.mxu0 %v748_v10 }
  0x53   : > { %643 = vmatprep.subr.bf16.mxu0 %v866_v2 }
  0x54   : > { %662 = vmatpush3.bf16.msra.mxu1 %v756_v16 }
  0x55   : > { %663 = vmatprep.subr.bf16.mxu1 %v866_v2 }
  0x56   : > { %644 = vmatpush3.bf16.msra.mxu0 %v749_v12 }
  0x57   : > { %645 = vmatprep.subr.bf16.mxu0 %v866_v2 }
  0x58   : > { %664 = vmatpush3.bf16.msra.mxu1 %v757_v18 }
  0x59   : > { %665 = vmatprep.subr.bf16.mxu1 %v866_v2 }
  0x5a   : > { %646 = vmatpush3.bf16.msra.mxu0 %v750_v14 }
  0x5c   : > { %666 = vmatpush3.bf16.msra.mxu1 %v758_v19 }
  0x5d   : > { %648 = vmatmul.mubr.bf16.vlgmr.msra.gmra.mrb[0].mxu0 %v164_v17 }
 0x130   : > { %v263_v20 = vpop.f32.mrb[0].mxu0 }
 0x131   : > { %v269_v21 = vmax.f32 %v263_v20, 0.0  ;;  %v649_v22 = vpop.f32.mrb[1].mxu0 }
 0x132   : > { %v266_v23 = vpop.f32.mrb[2].mxu0 }
 0x133   : > { %v270_v24 = vpack.c.bf16 %v269_v21, %v269_v21  ;;  %v650_v25 = vpop.f32.mrb[3].mxu0 }
 0x135   : > { %668 = vmatmul.mubr.bf16.vlgmr.msra.gmra.mrb[0].mxu1 %v270_v24 }
 0x208   : > { %v370_v26 = vpop.f32.mrb[0].mxu1 }
 0x209   : > { %v371_v27 = vadd.f32 %v370_v26, %v163_v15  ;;  %v669_v28 = vpop.f32.mrb[1].mxu1 }
 0x20a   : > { %v373_v29 = vpop.f32.mrb[2].mxu1 }
 0x20b   : > { %v376_v30 = vmax.f32 %v371_v27, 0.0  ;;  %v670_v31 = vpop.f32.mrb[3].mxu1 }
 0x20d   : > { %377 = vst [vmem:[#allocation2] sm:$0xff] %v376_v30 }
 0x20e PF: > { %p589_p7 = scmp.ne.s32.totalorder %s905_s13, 10 }
 0x20f   : > { %v759_v32 = vld [vmem:[%s972_s23] sm:$0xff] (!%p589_p7)   ;;  %v868_v33 = vmov (!%p589_p7), 0.0   ;;  %v760_v34 = vld [vmem:[%s972_s23 + $0x8] sm:$0xff] (!%p589_p7)   ;;  %vm869_vm1 = vmmov (!%p589_p7), 0   ;;  %v761_v35 = vld [vmem:[%s972_s23 + $0x10] sm:$0xff] (!%p589_p7)  }
 0x210   : > { %381 = sbr.rel (%p589_p7) target bundleno = 775 (0x307), region = 44  ;;  %671 = vmatprep.subr.bf16.mxu0 (!%p589_p7), %v868_v33  ;;  %687 = vmatprep.mubr.msk.bf16.mxu0 (!%p589_p7), %vm869_vm1, %v868_v33  ;;  %v762_v36 = vld [vmem:[%s972_s23 + $0x18] sm:$0xff] (!%p589_p7)   ;;  %v763_v37 = vld [vmem:[%s972_s23 + $0x20] sm:$0xff] (!%p589_p7)   ;;  %v764_v38 = vld [vmem:[%s972_s23 + $0x28] sm:$0xff] (!%p589_p7)  }
 0x211   : > { %672 = vmatpush3.bf16.msra.mxu0 (!%p589_p7), %v759_v32  ;;  %v765_v39 = vld [vmem:[%s972_s23 + $0x30] sm:$0xff] (!%p589_p7)   ;;  %v766_v40 = vld [vmem:[%s972_s23 + $0x38] sm:$0xff] (!%p589_p7)  }
 0x212   : > { %673 = vmatprep.subr.bf16.mxu0 (!%p589_p7), %v868_v33 }
 0x214   : > { %v382_v41 = vld [vmem:[#allocation2] sm:$0xff] (!%p589_p7) }
 0x215   : > { %674 = vmatpush3.bf16.msra.mxu0 (!%p589_p7), %v760_v34  ;;  %v383_v42 = vpack.c.bf16 (!%p589_p7), %v382_v41, %v382_v41 }
 0x216   : > { %675 = vmatprep.subr.bf16.mxu0 (!%p589_p7), %v868_v33 }
 0x219   : > { %676 = vmatpush3.bf16.msra.mxu0 %v761_v35 }
 0x21a   : > { %677 = vmatprep.subr.bf16.mxu0 %v868_v33 }
 0x21d   : > { %678 = vmatpush3.bf16.msra.mxu0 %v762_v36 }
 0x21e   : > { %679 = vmatprep.subr.bf16.mxu0 %v868_v33 }
 0x221   : > { %680 = vmatpush3.bf16.msra.mxu0 %v763_v37 }
 0x222   : > { %681 = vmatprep.subr.bf16.mxu0 %v868_v33 }
 0x225   : > { %682 = vmatpush3.bf16.msra.mxu0 %v764_v38 }
 0x226   : > { %683 = vmatprep.subr.bf16.mxu0 %v868_v33 }
 0x229   : > { %684 = vmatpush3.bf16.msra.mxu0 %v765_v39 }
 0x22a   : > { %685 = vmatprep.subr.bf16.mxu0 %v868_v33 }
 0x22d   : > { %686 = vmatpush3.bf16.msra.mxu0 %v766_v40 }
 0x230   : > { %688 = vmatmul.mubr.bf16.vlgmr.msra.gmra.mrb[0].mxu0 %v383_v42 }
 0x303   : > { %v482_v43 = vpop.f32.mrb[0].mxu0 }
 0x304   : > { %488 = vst [vmem:[#allocation6] sm:$0xff] %v482_v43  ;;  %v689_v44 = vpop.f32.mrb[1].mxu0 }
 0x305   : > { %v485_v45 = vpop.f32.mrb[2].mxu0 }
 0x306   : > { %v690_v46 = vpop.f32.mrb[3].mxu0 }
 0x307 PF: > { %p702_p4 = scmp.eq.s32.totalorder %s905_s13, 10  ;;  %s870_s12 = smov [#allocation6]  }
 0x308   : > { %s496_s18 = sshll.u32 %s870_s12, 4  ;;  %s497_s18 = int_to_ptr.vmem [resolvable:$true] %s496_s18 }
 0x309   : > { %s797_s26 = scalar_lea.vmem %s497_s18, 128  ;;  %p804_p12 = scmp.lt.s32.totalorder %s497_s18, %s497_s18 }
 0x30a   : > { %p798_p5 = scmp.ne.s32.totalorder %s497_s18, %s797_s26  ;;  %p805_p0 = scmp.lt.s32.totalorder %s797_s26, %s797_s26 }
 0x30c   : > { %p799_p6 = pnand %p798_p5, %p702_p4  ;;  %p806_p1 = por %p805_p0, %p804_p12 }
 0x30e   : > { %p800_p10 = pneg %p799_p6 }
 0x310   : > { %p807_p2 = pnand %p806_p1, %p800_p10 }
 0x312   : > { %810 = shalt.err (!%p807_p2)
}
 0x313   : > { %s811_s29 = scalar_lea.hbm %s1046_s2, 128 }
 0x314   : > { %p812_p11 = scmp.ne.s32.totalorder %s1046_s2, %s811_s29  ;;  %p817_p9 = scmp.lt.u32.totalorder %s811_s29, %s1046_s2 }
 0x316   : > { %p813_p13 = pnand %p812_p11, %p702_p4 }
 0x318   : > { %p814_p3 = pneg %p813_p13 }
 0x31a   : > { %p819_p8 = pnand %p817_p9, %p814_p3 }
 0x31c   : > { %822 = shalt.err (!%p819_p8)
}
 0x31d   : > { %694 = dma.vmem_to_hbm [thread:$0]  (%p702_p4), %s497_s18, 128, %s1046_s2, [#allocation5]  }
 0x31e   : > { %844 = dma.done.wait (%p702_p4), [#allocation5], 128  }
 0x31f   : > { %846 = vsyncadd (%p702_p4), [#allocation5], 4294967168 }
 0x320 PF: > { %p13_p7 = scmp.ge.s32.totalorder %s908_s14, 13   ;;  %s1050_s9 = smov %s853_s10 }
 0x321   : > { %s1051_s10 = smov %s857_s11  ;;  %s1052_s11 = smov %s918_s17 }
 0x322   : > { %s1053_s12 = smov %s908_s14  ;;  %15 = sbr.rel (!%p13_p7) target bundleno = 4 (0x4), region = 78 }
 0x329   :  { %509 = vsyncpa [#allocation4], 1 }
 0x32a   :  { %511 = vsyncpa [#allocation4 + $0x1], 1 }
 0x32b   :  { %512 = vsyncpa [#allocation5], 1 }
 0x32c   :  { %514 = vsyncpa [#allocation5 + $0x1], 1 }

</bundles_post_ra>
